<compile_context>
chip_gen: v6e
topology: v6e:2x2x1
jax: 0.10.0
libtpu: 0.0.40
codegen_flags: <defaults>
</compile_context>

<pallas_src>
import jax
import jax.numpy as jnp
from jax.experimental import pallas as pl
from jax.experimental.pallas import tpu as pltpu


def _round_up(x, m):
    return ((x + m - 1) // m) * m


def _choose_block_b(B):
    if B <= 256:
        # Single full-batch tile (block == array dims -> no divisibility or
        # ragged-block concerns); nothing worth sharding across v7x's second
        # TensorCore at this size.
        return B
    # Large batches: big 256-aligned tiles (cap 4096 rows) amortize the
    # ~0.35us per-grid-step overhead and keep per-step DMAs large, while the
    # cdiv(B, 2) term keeps the grid length >= 2 so both v7x TensorCores get
    # work via the "parallel" batch axis.  VMEM is a non-issue: even a
    # 4096-row tile's streamed slabs + f32 intermediates are only a few MiB.
    return min(4096, _round_up(pl.cdiv(B, 2), 256))


def critic_kernel(s_ref, a_ref,
                  w1_ref, b1_ref,
                  w2h_ref, w2a_ref, b2_ref,
                  w3_ref, b3_ref,
                  out_ref):
    # fc1 + ReLU.  Cast the streamed state tile to the weight dtype so the
    # MXU uses its native bf16 path when bf16 params are supplied (no-op for
    # f32); accumulate in f32 and apply bias/ReLU on the f32 accumulator.
    w1 = w1_ref[...]
    h1 = jnp.dot(s_ref[...].astype(w1.dtype), w1,
                 preferred_element_type=jnp.float32)
    h1 = jnp.maximum(h1 + b1_ref[...].astype(jnp.float32), 0.0)

    # fc2 on cat(hidden, action) via split weights (bit-equivalent to concat).
    w2h = w2h_ref[...]
    w2a = w2a_ref[...]
    h2 = (jnp.dot(h1.astype(w2h.dtype), w2h,
                  preferred_element_type=jnp.float32)
          + jnp.dot(a_ref[...].astype(w2a.dtype), w2a,
                    preferred_element_type=jnp.float32)
          + b2_ref[...].astype(jnp.float32))
    h2 = jnp.maximum(h2, 0.0)

    # fc3: Q head with output width 1.  Avoid a 1-wide MXU GEMM -- VPU
    # multiply against the (1, 64) weight row + lane (XLU) reduce; scalar
    # bias added from SMEM on the f32 result.
    w3_row = w3_ref[...].astype(jnp.float32)                  # (1, 64)
    q = jnp.sum(h2 * w3_row, axis=-1, keepdims=True)          # (TB, 1)
    # TODO(synk): if profiling shows writeback/masked-store overhead from the
    # (TB, 1) output block, switch to a lane-dense (1, 1, TB) output layout.
    out_ref[...] = (q + b3_ref[0, 0]).astype(out_ref.dtype)


def critic_forward(state, action, params, *, block_b=None):
    """state: (B, state_size), action: (B, action_size) -> (B, 1) f32."""
    B, S = state.shape
    A = action.shape[1]
    w1, b1, w2h, w2a, b2, w3_row, b3 = params

    if block_b is None:
        block_b = _choose_block_b(B)
    elif block_b != B:
        block_b = max(8, _round_up(block_b, 8))

    grid = (pl.cdiv(B, block_b),)

    def tiled(feat):
        # Activation / output tiles: one (block_b, feat) slab per grid step.
        # Ragged last block (B not a multiple of block_b) is handled by
        # Pallas: reads are clamped, stores beyond B are masked.
        return pl.BlockSpec((block_b, feat), lambda i: (i, 0))

    def resident(shape):
        # Weights / biases: same block every step -> fetched once, VMEM-resident.
        return pl.BlockSpec(shape, lambda i: (0, 0))

    # Advisory cost so XLA overlaps/schedules this kernel well when composed
    # inside a larger training step.
    param_bytes = sum(int(p.size) * p.dtype.itemsize
                      for p in (w1, b1, w2h, w2a, b2, w3_row, b3))
    cost = pl.CostEstimate(
        flops=2 * B * (S * 128 + 128 * 64 + A * 64 + 64),
        transcendentals=0,
        bytes_accessed=(int(state.size) * state.dtype.itemsize
                        + int(action.size) * action.dtype.itemsize
                        + B * 4 + param_bytes),
    )

    # NOTE: if the data producer can emit a fused (B, S+A) array, passing it
    # as a single streamed input (sliced in-kernel) halves per-step DMA count.
    return pl.pallas_call(
        critic_kernel,
        out_shape=jax.ShapeDtypeStruct((B, 1), jnp.float32),
        grid=grid,
        in_specs=[
            tiled(S),                                   # state    (B, S)
            tiled(A),                                   # action   (B, A)
            resident(w1.shape),                         # w1       (S, 128)
            resident(b1.shape),                         # b1       (1, 128)
            resident(w2h.shape),                        # w2h      (128, 64)
            resident(w2a.shape),                        # w2a      (A, 64)
            resident(b2.shape),                         # b2       (1, 64)
            resident(w3_row.shape),                     # w3 row   (1, 64)
            pl.BlockSpec((1, 1), lambda i: (0, 0),
                         memory_space=pltpu.MemorySpace.SMEM),  # b3 scalar
        ],
        out_specs=tiled(1),
        compiler_params=pltpu.CompilerParams(
            dimension_semantics=("parallel",)),
        cost_estimate=cost,
    )(state, action, w1, b1, w2h, w2a, b2, w3_row, b3)


def init_critic_params(key, state_size, action_size, dtype=jnp.float32):
    """nn.Linear-style init: U(-1/sqrt(fan_in), 1/sqrt(fan_in)).

    Returns (w1, b1, w2h, w2a, b2, w3_row, b3).  Pass dtype=jnp.bfloat16 (and
    bf16 state/action) to halve weight + activation HBM traffic; the kernel
    still accumulates in f32.
    """
    h1, h2 = 128, 64
    k = jax.random.split(key, 6)

    def uniform(kk, shape, fan_in):
        bound = 1.0 / jnp.sqrt(jnp.float32(fan_in))
        return jax.random.uniform(kk, shape, jnp.float32, -bound, bound)

    w1 = uniform(k[0], (state_size, h1), state_size)               # fc1 (in, out)
    b1 = uniform(k[1], (1, h1), state_size)
    w2 = uniform(k[2], (h1 + action_size, h2), h1 + action_size)   # fc2 (in, out)
    b2 = uniform(k[3], (1, h2), h1 + action_size)
    w3_row = uniform(k[4], (1, h2), h2)                            # fc3 as a row
    b3 = uniform(k[5], (1, 1), h2)

    w2h = w2[:h1, :]       # multiplies the hidden part of cat(h, a)
    w2a = w2[h1:, :]       # multiplies the action part

    def cast(x):
        return x.astype(dtype)

    # b3 stays f32 (SMEM scalar, added on the f32 accumulator).
    return (cast(w1), cast(b1), cast(w2h), cast(w2a), cast(b2), cast(w3_row),
            b3.astype(jnp.float32))


def critic_reference(state, action, params):
    """Plain-JAX reference matching the PyTorch forward (and kernel casts)."""
    w1, b1, w2h, w2a, b2, w3_row, b3 = params
    f32 = jnp.float32
    s = state.astype(w1.dtype)
    a = action.astype(w2a.dtype)
    h1 = jnp.maximum(
        jnp.dot(s, w1, preferred_element_type=f32) + b1.astype(f32), 0.0)
    h2 = jnp.maximum(
        jnp.dot(h1.astype(w2h.dtype), w2h, preferred_element_type=f32)
        + jnp.dot(a, w2a, preferred_element_type=f32)
        + b2.astype(f32), 0.0)
    return jnp.sum(h2 * w3_row.astype(f32), axis=-1, keepdims=True) + b3[0, 0]


if __name__ == "__main__":
    key = jax.random.PRNGKey(0)
    state_size, action_size = 16, 4

    kp, ks, ka, ks2, ka2, ks3, ka3 = jax.random.split(key, 7)
    params = init_critic_params(kp, state_size, action_size)

    # Small batch: single full-batch tile.
    b_small = 8
    state = jax.random.normal(ks, (b_small, state_size), jnp.float32)
    action = jax.random.normal(ka, (b_small, action_size), jnp.float32)
    out = jax.block_until_ready(critic_forward(state, action, params))
    ref = critic_reference(state, action, params)
    assert out.shape == (b_small, 1)
    assert jnp.allclose(out, ref, atol=1e-4, rtol=1e-4)

    # Larger, non-tile-multiple batch: 2 grid steps (block_b=512), ragged
    # last block, no input padding.
    b_big = 520
    state2 = jax.random.normal(ks2, (b_big, state_size), jnp.float32)
    action2 = jax.random.normal(ka2, (b_big, action_size), jnp.float32)
    out2 = jax.block_until_ready(critic_forward(state2, action2, params))
    ref2 = critic_reference(state2, action2, params)
    assert out2.shape == (b_big, 1)
    assert jnp.allclose(out2, ref2, atol=1e-4, rtol=1e-4)

    # bf16 params + bf16 streamed activations (half the HBM traffic,
    # native-bf16 MXU path); f32 accumulation inside the kernel.
    params_bf16 = init_critic_params(kp, state_size, action_size,
                                     dtype=jnp.bfloat16)
    b_mid = 300
    state3 = jax.random.normal(ks3, (b_mid, state_size),
                               jnp.float32).astype(jnp.bfloat16)
    action3 = jax.random.normal(ka3, (b_mid, action_size),
                                jnp.float32).astype(jnp.bfloat16)
    out3 = jax.block_until_ready(critic_forward(state3, action3, params_bf16))
    ref3 = critic_reference(state3, action3, params_bf16)
    assert out3.shape == (b_mid, 1)
    assert jnp.allclose(out3, ref3, atol=2e-2, rtol=2e-2)

    print("KERNEL_OK")
</pallas_src>

<mosaic_0001>
module attributes {stable_mosaic.version = 11 : i64} {
  func.func @critic_kernel(%arg0: i32, %arg1: memref<8x16xf32, #tpu.memory_space<vmem>>, %arg2: memref<8x4xf32, #tpu.memory_space<vmem>>, %arg3: memref<16x128xf32, #tpu.memory_space<vmem>>, %arg4: memref<1x128xf32, #tpu.memory_space<vmem>>, %arg5: memref<128x64xf32, #tpu.memory_space<vmem>>, %arg6: memref<4x64xf32, #tpu.memory_space<vmem>>, %arg7: memref<1x64xf32, #tpu.memory_space<vmem>>, %arg8: memref<1x64xf32, #tpu.memory_space<vmem>>, %arg9: memref<1x1xf32, #tpu.memory_space<smem>>, %arg10: memref<8x1xf32, #tpu.memory_space<vmem>>) attributes {dimension_semantics = [#tpu.dimension_semantics<parallel>], iteration_bounds = array<i64: 1>, scalar_prefetch = 0 : i64, scratch_operands = 0 : i64, tpu.core_type = #tpu.core_type<tc>, window_params = [{transform_indices = @transform_0, window_bounds = array<i64: 8, 16>}, {transform_indices = @transform_1, window_bounds = array<i64: 8, 4>}, {pipeline_mode = #tpu.pipeline_mode<synchronous>, transform_indices = @transform_2, window_bounds = array<i64: 16, 128>}, {pipeline_mode = #tpu.pipeline_mode<synchronous>, transform_indices = @transform_3, window_bounds = array<i64: 1, 128>}, {pipeline_mode = #tpu.pipeline_mode<synchronous>, transform_indices = @transform_4, window_bounds = array<i64: 128, 64>}, {pipeline_mode = #tpu.pipeline_mode<synchronous>, transform_indices = @transform_5, window_bounds = array<i64: 4, 64>}, {pipeline_mode = #tpu.pipeline_mode<synchronous>, transform_indices = @transform_6, window_bounds = array<i64: 1, 64>}, {pipeline_mode = #tpu.pipeline_mode<synchronous>, transform_indices = @transform_7, window_bounds = array<i64: 1, 64>}, {transform_indices = @transform_8, window_bounds = array<i64: 1, 1>}, {transform_indices = @transform_9, window_bounds = array<i64: 8, 1>}]} {
    %c0 = arith.constant 0 : index
    %c0_0 = arith.constant 0 : index
    %0 = vector.load %arg3[%c0, %c0_0] : memref<16x128xf32, #tpu.memory_space<vmem>>, vector<16x128xf32>
    %c0_1 = arith.constant 0 : index
    %c0_2 = arith.constant 0 : index
    %1 = vector.load %arg1[%c0_1, %c0_2] : memref<8x16xf32, #tpu.memory_space<vmem>>, vector<8x16xf32>
    %cst = arith.constant dense<0.000000e+00> : vector<8x128xf32>
    %2 = tpu.matmul %1, %0, %cst {dimension_numbers = #tpu.dot_dimension_numbers<[1], [0], [0], [1], [0, 0, 1, 1], [], []>} : vector<8x16xf32>, vector<16x128xf32>, vector<8x128xf32> -> vector<8x128xf32>
    %c0_3 = arith.constant 0 : index
    %c0_4 = arith.constant 0 : index
    %3 = vector.load %arg4[%c0_3, %c0_4] : memref<1x128xf32, #tpu.memory_space<vmem>>, vector<1x128xf32>
    %4 = vector.broadcast %3 : vector<1x128xf32> to vector<8x128xf32>
    %5 = arith.addf %2, %4 : vector<8x128xf32>
    %cst_5 = arith.constant 0.000000e+00 : f32
    %6 = vector.broadcast %cst_5 : f32 to vector<8x128xf32>
    %7 = arith.maximumf %5, %6 : vector<8x128xf32>
    %c0_6 = arith.constant 0 : index
    %c0_7 = arith.constant 0 : index
    %8 = vector.load %arg5[%c0_6, %c0_7] : memref<128x64xf32, #tpu.memory_space<vmem>>, vector<128x64xf32>
    %c0_8 = arith.constant 0 : index
    %c0_9 = arith.constant 0 : index
    %9 = vector.load %arg6[%c0_8, %c0_9] : memref<4x64xf32, #tpu.memory_space<vmem>>, vector<4x64xf32>
    %cst_10 = arith.constant dense<0.000000e+00> : vector<8x64xf32>
    %10 = tpu.matmul %7, %8, %cst_10 {dimension_numbers = #tpu.dot_dimension_numbers<[1], [0], [0], [1], [0, 0, 1, 1], [], []>} : vector<8x128xf32>, vector<128x64xf32>, vector<8x64xf32> -> vector<8x64xf32>
    %c0_11 = arith.constant 0 : index
    %c0_12 = arith.constant 0 : index
    %11 = vector.load %arg2[%c0_11, %c0_12] : memref<8x4xf32, #tpu.memory_space<vmem>>, vector<8x4xf32>
    %cst_13 = arith.constant dense<0.000000e+00> : vector<8x64xf32>
    %12 = tpu.matmul %11, %9, %cst_13 {dimension_numbers = #tpu.dot_dimension_numbers<[1], [0], [0], [1], [0, 0, 1, 1], [], []>} : vector<8x4xf32>, vector<4x64xf32>, vector<8x64xf32> -> vector<8x64xf32>
    %13 = arith.addf %10, %12 : vector<8x64xf32>
    %c0_14 = arith.constant 0 : index
    %c0_15 = arith.constant 0 : index
    %14 = vector.load %arg7[%c0_14, %c0_15] : memref<1x64xf32, #tpu.memory_space<vmem>>, vector<1x64xf32>
    %15 = vector.broadcast %14 : vector<1x64xf32> to vector<8x64xf32>
    %16 = arith.addf %13, %15 : vector<8x64xf32>
    %cst_16 = arith.constant 0.000000e+00 : f32
    %17 = vector.broadcast %cst_16 : f32 to vector<8x64xf32>
    %18 = arith.maximumf %16, %17 : vector<8x64xf32>
    %c0_17 = arith.constant 0 : index
    %c0_18 = arith.constant 0 : index
    %19 = vector.load %arg8[%c0_17, %c0_18] : memref<1x64xf32, #tpu.memory_space<vmem>>, vector<1x64xf32>
    %20 = vector.broadcast %19 : vector<1x64xf32> to vector<8x64xf32>
    %21 = arith.mulf %18, %20 : vector<8x64xf32>
    %cst_19 = arith.constant dense<0.000000e+00> : vector<8xf32>
    %22 = vector.multi_reduction <add>, %21, %cst_19 [1] : vector<8x64xf32> to vector<8xf32>
    %23 = vector.shape_cast %22 : vector<8xf32> to vector<8x1xf32>
    %c0_20 = arith.constant 0 : index
    %c0_21 = arith.constant 0 : index
    %24 = memref.load %arg9[%c0_20, %c0_21] : memref<1x1xf32, #tpu.memory_space<smem>>
    %25 = vector.broadcast %24 : f32 to vector<8x1xf32>
    %26 = arith.addf %23, %25 : vector<8x1xf32>
    %c0_22 = arith.constant 0 : index
    %c0_23 = arith.constant 0 : index
    %27 = vector.load %arg10[%c0_22, %c0_23] : memref<8x1xf32, #tpu.memory_space<vmem>>, vector<8x1xf32>
    tpu.vector_store %arg10[%c0_22, %c0_23], %26 {strides = array<i32>} : memref<8x1xf32, #tpu.memory_space<vmem>>, vector<8x1xf32>,
    return
  }
  func.func @transform_0(%arg0: i32) -> (i32, i32) {
    %c0_i32 = arith.constant 0 : i32
    %c0_i32_0 = arith.constant 0 : i32
    return %arg0, %c0_i32 : i32, i32
  }
  func.func @transform_1(%arg0: i32) -> (i32, i32) {
    %c0_i32 = arith.constant 0 : i32
    %c0_i32_0 = arith.constant 0 : i32
    return %arg0, %c0_i32 : i32, i32
  }
  func.func @transform_2(%arg0: i32) -> (i32, i32) {
    %c0_i32 = arith.constant 0 : i32
    %c0_i32_0 = arith.constant 0 : i32
    %c0_i32_1 = arith.constant 0 : i32
    return %c0_i32, %c0_i32_0 : i32, i32
  }
  func.func @transform_3(%arg0: i32) -> (i32, i32) {
    %c0_i32 = arith.constant 0 : i32
    %c0_i32_0 = arith.constant 0 : i32
    %c0_i32_1 = arith.constant 0 : i32
    return %c0_i32, %c0_i32_0 : i32, i32
  }
  func.func @transform_4(%arg0: i32) -> (i32, i32) {
    %c0_i32 = arith.constant 0 : i32
    %c0_i32_0 = arith.constant 0 : i32
    %c0_i32_1 = arith.constant 0 : i32
    return %c0_i32, %c0_i32_0 : i32, i32
  }
  func.func @transform_5(%arg0: i32) -> (i32, i32) {
    %c0_i32 = arith.constant 0 : i32
    %c0_i32_0 = arith.constant 0 : i32
    %c0_i32_1 = arith.constant 0 : i32
    return %c0_i32, %c0_i32_0 : i32, i32
  }
  func.func @transform_6(%arg0: i32) -> (i32, i32) {
    %c0_i32 = arith.constant 0 : i32
    %c0_i32_0 = arith.constant 0 : i32
    %c0_i32_1 = arith.constant 0 : i32
    return %c0_i32, %c0_i32_0 : i32, i32
  }
  func.func @transform_7(%arg0: i32) -> (i32, i32) {
    %c0_i32 = arith.constant 0 : i32
    %c0_i32_0 = arith.constant 0 : i32
    %c0_i32_1 = arith.constant 0 : i32
    return %c0_i32, %c0_i32_0 : i32, i32
  }
  func.func @transform_8(%arg0: i32) -> (i32, i32) {
    %c0_i32 = arith.constant 0 : i32
    %c0_i32_0 = arith.constant 0 : i32
    %c0_i32_1 = arith.constant 0 : i32
    return %c0_i32, %c0_i32_0 : i32, i32
  }
  func.func @transform_9(%arg0: i32) -> (i32, i32) {
    %c0_i32 = arith.constant 0 : i32
    %c0_i32_0 = arith.constant 0 : i32
    return %arg0, %c0_i32 : i32, i32
  }
}

</mosaic_0001>

<bundles_post_ra>
// kernel: tpu_custom_call.1
= control target key start
LH: loop header
LB: loop body
LE: loop exit
PB: predicated region body
PF: predicated region fallthrough
CT: control target
= control target key end

     0   :  { %v391_v0 = vmov 0.0   ;;  %vm392_vm0 = vmmov 0   ;;  %vm43_vm1 = vcmask 130048   ;;  %vm140_vm2 = vcmask 1043456   ;;  %s546_s2 = inlined_call_operand.vmem [shape: f32[16,128], index: 2, kind: input, shape index: {}]   ;;  %s547_s0 = inlined_call_operand.vmem [shape: f32[8,16], index: 0, kind: input, shape index: {}]   ;;  %s548_s4 = inlined_call_operand.vmem [shape: f32[128,64], index: 4, kind: input, shape index: {}]   ;;  %s549_s5 = inlined_call_operand.vmem [shape: f32[4,64], index: 5, kind: input, shape index: {}]   ;;  %s550_s1 = inlined_call_operand.vmem [shape: f32[8,4], index: 1, kind: input, shape index: {}]   ;;  %s551_s3 = inlined_call_operand.vmem [shape: f32[1,128], index: 3, kind: input, shape index: {}]   ;;  %s552_s6 = inlined_call_operand.vmem [shape: f32[1,64], index: 6, kind: input, shape index: {}]   ;;  %s553_s7 = inlined_call_operand.vmem [shape: f32[1,64], index: 7, kind: input, shape index: {}]   ;;  %s554_s8 = inlined_call_operand.<no memory space> [shape: f32[1,1], index: 8, kind: input, shape index: {}]   ;;  %s555_s9 = inlined_call_operand.vmem [shape: f32[8,1], index: 9, kind: output, shape index: {}]  }
   0x1   :  { %342 = vmatprep.subr.mxu0 %v391_v0  ;;  %v34_v1 = vld [vmem:[%s546_s2 + $0x8] sm:$0xff]  ;;  %v33_v2 = vld [vmem:[%s546_s2] sm:$0xff]  ;;  %346 = vmatprep.mubr.msk.f32.mxu0 %vm392_vm0, %v391_v0  ;;  %v133_v4 = vld [vmem:[%s548_s4 + $0x78] sm:$0xff]  ;;  %vm136_vm3 = vcmask 31744   ;;  %vm301_vm4 = vcmask 523264   ;;  %v306_v38 = vstv %s554_s8  ;;  %vm308_vm5 = vcmask 7168  }
   0x2   :  { %343 = vmatpush3.msra.mxu0 %v34_v1  ;;  %v35_v3 = vld [vmem:[%s547_s0] sm:$0xff]  ;;  %354 = vmatprep.subr.mxu1 %v391_v0  ;;  %v132_v5 = vld [vmem:[%s548_s4 + $0x70] sm:$0xff]  ;;  %v131_v6 = vld [vmem:[%s548_s4 + $0x68] sm:$0xff] }
   0x3   :  { %344 = vmatprep.subr.mxu0 %v391_v0  ;;  %355 = vmatpush3.msra.mxu1 %v133_v4  ;;  %v130_v7 = vld [vmem:[%s548_s4 + $0x60] sm:$0xff]  ;;  %v129_v8 = vld [vmem:[%s548_s4 + $0x58] sm:$0xff]  ;;  %v128_v9 = vld [vmem:[%s548_s4 + $0x50] sm:$0xff] }
   0x4   :  { %345 = vmatpush3.msra.mxu0 %v33_v2  ;;  %356 = vmatprep.subr.mxu1 %v391_v0  ;;  %v127_v10 = vld [vmem:[%s548_s4 + $0x48] sm:$0xff]  ;;  %v126_v11 = vld [vmem:[%s548_s4 + $0x40] sm:$0xff]  ;;  %v125_v12 = vld [vmem:[%s548_s4 + $0x38] sm:$0xff] }
   0x5   :  { %347 = vmatmul.mubr.msk.f32.vlgmr.msra.gmra.mxu0 %vm43_vm1, %v35_v3  ;;  %357 = vmatpush3.msra.mxu1 %v132_v5  ;;  %v124_v13 = vld [vmem:[%s548_s4 + $0x30] sm:$0xff]  ;;  %v123_v14 = vld [vmem:[%s548_s4 + $0x28] sm:$0xff]  ;;  %v122_v15 = vld [vmem:[%s548_s4 + $0x20] sm:$0xff] }
   0x6   :  { %358 = vmatprep.subr.mxu1 %v391_v0  ;;  %349 = vmatprep.subr.mxu0 %v391_v0  ;;  %v121_v16 = vld [vmem:[%s548_s4 + $0x18] sm:$0xff]  ;;  %v120_v17 = vld [vmem:[%s548_s4 + $0x10] sm:$0xff]  ;;  %v134_v18 = vld [vmem:[%s549_s5] sm:$0xf] }
   0x7   :  { %359 = vmatpush3.msra.mxu1 %v131_v6  ;;  %351 = vmatprep.mubr.msk.f32.mxu0 %vm392_vm0, %v391_v0  ;;  %v119_v19 = vld [vmem:[%s548_s4 + $0x8] sm:$0xff]  ;;  %v135_v20 = vld [vmem:[%s550_s1] sm:$0xff] }
   0x8   :  { %360 = vmatprep.subr.mxu1 %v391_v0  ;;  %386 = vmatprep.mubr.msk.f32.mxu1 %vm392_vm0, %v391_v0  ;;  %v118_v21 = vld [vmem:[%s548_s4] sm:$0xff] }
   0x9   :  { %361 = vmatpush3.msra.mxu1 %v130_v7  ;;  %350 = vmatpush3.msk.msra.mxu0 %vm140_vm2, %v134_v18  ;;  %v314_v22 = vld [vmem:[%s551_s3] ss:$0 sm:$0xff] }
   0xa   :  { %362 = vmatprep.subr.mxu1 %v391_v0  ;;  %352 = vmatmul.mubr.msk.f32.vlgmr.msra.gmra.mxu0 %vm136_vm3, %v135_v20  ;;  %v318_v30 = vld [vmem:[%s552_s6] ss:$0 sm:$0xff] }
   0xb   :  { %363 = vmatpush3.msra.mxu1 %v129_v8  ;;  %v319_v34 = vld [vmem:[%s553_s7] ss:$0 sm:$0xff] }
   0xc   :  { %364 = vmatprep.subr.mxu1 %v391_v0 }
   0xd   :  { %365 = vmatpush3.msra.mxu1 %v128_v9 }
   0xe   :  { %366 = vmatprep.subr.mxu1 %v391_v0 }
   0xf   :  { %367 = vmatpush3.msra.mxu1 %v127_v10 }
  0x10   :  { %368 = vmatprep.subr.mxu1 %v391_v0 }
  0x11   :  { %369 = vmatpush3.msra.mxu1 %v126_v11 }
  0x12   :  { %370 = vmatprep.subr.mxu1 %v391_v0 }
  0x13   :  { %371 = vmatpush3.msra.mxu1 %v125_v12 }
  0x14   :  { %372 = vmatprep.subr.mxu1 %v391_v0 }
  0x15   :  { %373 = vmatpush3.msra.mxu1 %v124_v13 }
  0x16   :  { %374 = vmatprep.subr.mxu1 %v391_v0 }
  0x17   :  { %375 = vmatpush3.msra.mxu1 %v123_v14 }
  0x18   :  { %376 = vmatprep.subr.mxu1 %v391_v0 }
  0x19   :  { %377 = vmatpush3.msra.mxu1 %v122_v15 }
  0x1a   :  { %378 = vmatprep.subr.mxu1 %v391_v0 }
  0x1b   :  { %379 = vmatpush3.msra.mxu1 %v121_v16 }
  0x1c   :  { %380 = vmatprep.subr.mxu1 %v391_v0 }
  0x1d   :  { %381 = vmatpush3.msra.mxu1 %v120_v17 }
  0x1e   :  { %382 = vmatprep.subr.mxu1 %v391_v0 }
  0x1f   :  { %383 = vmatpush3.msra.mxu1 %v119_v19 }
  0x20   :  { %384 = vmatprep.subr.mxu1 %v391_v0 }
  0x21   :  { %385 = vmatpush3.msra.mxu1 %v118_v21 }
  0xc5   :  { %v113_v23 = vpop.f32.mrf.mxu0 }
  0xc6   :  { %v114_v24 = vadd.f32 %v314_v22, %v113_v23 }
  0xc7   :  { %v348_v25 = vpop.f32.mrf.mxu0 }
  0xc8   :  { %v117_v26 = vmax.f32 %v114_v24, 0.0 }
  0xca   :  { %387 = vmatmul.mubr.f32.vlgmr.msra.gmra.mxu1 %v117_v26  ;;  %v210_v27 = vpop.f32.mrf.mxu0 }
  0xcc   :  { %v353_v28 = vpop.f32.mrf.mxu0 }
 0x18a   :  { %v280_v29 = vpop.f32.mrf.mxu1 }
 0x18b   :  { %v281_v31 = vadd.f32 %v280_v29, %v210_v27 }
 0x18c   :  { %v388_v32 = vpop.f32.mrf.mxu1 }
 0x18d   :  { %v291_v33 = vadd.f32 %v318_v30, %v281_v31 }
 0x18f   :  { %v292_v35 = vmax.f32 %v291_v33, 0.0 }
 0x191   :  { %v300_v36 = vmul.f32 %v319_v34, %v292_v35 }
 0x193   :  { %v302_v37 = vsel %vm301_vm4, %v300_v36, 0.0 }
 0x194   :  { %303 = vadd.xlane.f32.xlu0 %v302_v37 }
 0x21d   :  { %v304_v39 = vpop.xlane.xlu0 %303 }
 0x21e   :  { %v307_v40 = vadd.f32 %v306_v38, %v304_v39 }
 0x220   :  { %309 = vst.msk [vmem:[%s555_s9] sm:$0xff] %vm308_vm5, %v307_v40 }

</bundles_post_ra>
